<compile_context>
chip_gen: v6e
topology: v6e:2x2x1
jax: 0.10.0
libtpu: 0.0.40
codegen_flags: <defaults>
</compile_context>

<pallas_src>
import jax
import jax.numpy as jnp
from jax.experimental import pallas as pl
from jax.experimental.pallas import tpu as pltpu


def se_kernel(x_ref, w1t_ref, w2t_ref, o_ref):
    # x_ref  : (Bblk, HW, C)   channels-last tile (C on the lane axis)
    # w1t_ref: (C,  C_r)       fc1 weight, pre-transposed
    # w2t_ref: (C_r, C)        fc2 weight, pre-transposed
    # o_ref  : (Bblk, HW, C)
    inv_hw = 1.0 / x_ref.shape[1]                       # compile-time constant

    # Squeeze: global average pool over HW (sublane axis), f32 accumulation.
    pooled = jnp.sum(x_ref[...].astype(jnp.float32), axis=1) * inv_hw   # (Bblk, C)

    # Excite: two small matmuls batched over Bblk, f32 accumulation on the MXU.
    h = jnp.dot(pooled, w1t_ref[...], preferred_element_type=jnp.float32)  # (Bblk, C_r)
    h = jnp.maximum(h, 0.0)
    s = jnp.dot(h, w2t_ref[...], preferred_element_type=jnp.float32)       # (Bblk, C)
    s = jax.nn.sigmoid(s)

    # Scale: re-read x from VMEM (keeps the big tile's live range short) and
    # broadcast the (Bblk, 1, C) gate across the HW sublane axis (cheap).
    o_ref[...] = (x_ref[...] * s[:, None, :]).astype(o_ref.dtype)


def _choose_bblk(B, per_batch_bytes, vmem_budget_bytes):
    """Largest divisor of B whose (in+out, double-buffered) block fits the
    budget, while keeping >=2 grid steps when B >= 2 (megacore on v7x)."""
    best = 1
    for cand in range(1, B + 1):
        if B % cand:
            continue
        if cand * per_batch_bytes > vmem_budget_bytes:
            continue
        if B >= 2 and B // cand < 2:
            continue
        best = cand
    return best


def se_module(x_nchw, w1, w2, *, vmem_block_budget_bytes=24 * 1024 * 1024):
    """x_nchw: (B, C, H, W); w1: (C_r, C) fc1 1x1-conv weight; w2: (C, C_r)."""
    B, C, H, W = x_nchw.shape
    HW = H * W
    C_r = w1.shape[0]
    assert w1.shape == (C_r, C) and w2.shape == (C, C_r)

    # Channels-last so the lane axis is C (lane-dense loads/stores).
    x_flat = jnp.transpose(x_nchw, (0, 2, 3, 1)).reshape(B, HW, C)
    w1_t = jnp.transpose(w1)    # (C, C_r)
    w2_t = jnp.transpose(w2)    # (C_r, C)

    itemsize = jnp.dtype(x_nchw.dtype).itemsize
    # input + output blocks, each double-buffered => 4 copies of the x block.
    per_batch_bytes = 4 * HW * C * itemsize
    bblk = _choose_bblk(B, per_batch_bytes, vmem_block_budget_bytes)
    grid = (B // bblk,)

    weight_bytes = 2 * (w1_t.size * itemsize + w2_t.size * itemsize)  # double-buffered
    required = bblk * per_batch_bytes + weight_bytes + (4 << 20)      # + headroom
    vmem_limit = int(min(max(required, 16 << 20), 100 << 20))
    # TODO(synk): if a single-batch (HW, C) block exceeds ~32 MiB (v7x's 64 MiB
    # physical VMEM halved for double-buffering), switch to the two-pass design
    # (gate kernel + HW-tiled scale kernel) instead of shrinking the tile.

    out_flat = pl.pallas_call(
        se_kernel,
        out_shape=jax.ShapeDtypeStruct((B, HW, C), x_nchw.dtype),
        grid_spec=pltpu.PrefetchScalarGridSpec(
            num_scalar_prefetch=0,
            grid=grid,
            in_specs=[
                # Full (HW, C) in the last two dims => (8,128) rule satisfied
                # for arbitrary HW / C.
                pl.BlockSpec((bblk, HW, C), lambda b: (b, 0, 0)),
                pl.BlockSpec(w1_t.shape, lambda b: (0, 0)),
                pl.BlockSpec(w2_t.shape, lambda b: (0, 0)),
            ],
            out_specs=pl.BlockSpec((bblk, HW, C), lambda b: (b, 0, 0)),
        ),
        compiler_params=pltpu.CompilerParams(
            dimension_semantics=("parallel",),
            vmem_limit_bytes=vmem_limit,
        ),
    )(x_flat, w1_t, w2_t)

    return jnp.transpose(out_flat.reshape(B, H, W, C), (0, 3, 1, 2))


def se_module_ref(x, w1, w2):
    """Pure-JAX reference matching the PyTorch module."""
    pooled = jnp.mean(x, axis=(2, 3), keepdims=True)           # (B, C, 1, 1)
    h = jnp.einsum('rc,bcij->brij', w1, pooled)                # (B, C_r, 1, 1)
    h = jnp.maximum(h, 0.0)
    s = jnp.einsum('cr,brij->bcij', w2, h)                     # (B, C, 1, 1)
    s = jax.nn.sigmoid(s)
    return x * s


if __name__ == "__main__":
    B, C, H, W = 2, 8, 16, 16
    reduction = 4
    C_r = C // reduction

    key = jax.random.PRNGKey(0)
    kx, k1, k2 = jax.random.split(key, 3)

    x = jax.random.normal(kx, (B, C, H, W), dtype=jnp.float32)
    # 1x1 conv weights with kernel dims squeezed: fc1 (C_r, C), fc2 (C, C_r)
    w1 = jax.random.normal(k1, (C_r, C), dtype=jnp.float32) * 0.1
    w2 = jax.random.normal(k2, (C, C_r), dtype=jnp.float32) * 0.1

    out = se_module(x, w1, w2)
    out = jax.block_until_ready(out)

    ref = se_module_ref(x, w1, w2)
    assert out.shape == (B, C, H, W)
    assert jnp.allclose(out, ref, atol=1e-5, rtol=1e-5), "mismatch vs reference"

    print("KERNEL_OK")
</pallas_src>

<mosaic_0001>
module attributes {stable_mosaic.version = 11 : i64} {
  func.func @se_kernel(%arg0: i32, %arg1: memref<1x256x8xf32, #tpu.memory_space<vmem>>, %arg2: memref<8x2xf32, #tpu.memory_space<vmem>>, %arg3: memref<2x8xf32, #tpu.memory_space<vmem>>, %arg4: memref<1x256x8xf32, #tpu.memory_space<vmem>>) attributes {dimension_semantics = [#tpu.dimension_semantics<parallel>], iteration_bounds = array<i64: 2>, scalar_prefetch = 0 : i64, scratch_operands = 0 : i64, tpu.core_type = #tpu.core_type<tc>, window_params = [{transform_indices = @transform_0, window_bounds = array<i64: 1, 256, 8>}, {pipeline_mode = #tpu.pipeline_mode<synchronous>, transform_indices = @transform_1, window_bounds = array<i64: 8, 2>}, {pipeline_mode = #tpu.pipeline_mode<synchronous>, transform_indices = @transform_2, window_bounds = array<i64: 2, 8>}, {transform_indices = @transform_3, window_bounds = array<i64: 1, 256, 8>}]} {
    %c0 = arith.constant 0 : index
    %c0_0 = arith.constant 0 : index
    %c0_1 = arith.constant 0 : index
    %0 = vector.load %arg1[%c0, %c0_0, %c0_1] : memref<1x256x8xf32, #tpu.memory_space<vmem>>, vector<1x256x8xf32>
    %cst = arith.constant dense<0.000000e+00> : vector<1x8xf32>
    %1 = vector.multi_reduction <add>, %0, %cst [1] : vector<1x256x8xf32> to vector<1x8xf32>
    %cst_2 = arith.constant 3.906250e-03 : f32
    %2 = vector.broadcast %cst_2 : f32 to vector<1x8xf32>
    %3 = arith.mulf %1, %2 : vector<1x8xf32>
    %c0_3 = arith.constant 0 : index
    %c0_4 = arith.constant 0 : index
    %4 = vector.load %arg2[%c0_3, %c0_4] : memref<8x2xf32, #tpu.memory_space<vmem>>, vector<8x2xf32>
    %cst_5 = arith.constant dense<0.000000e+00> : vector<1x2xf32>
    %5 = tpu.matmul %3, %4, %cst_5 {dimension_numbers = #tpu.dot_dimension_numbers<[1], [0], [0], [1], [0, 0, 1, 1], [], []>} : vector<1x8xf32>, vector<8x2xf32>, vector<1x2xf32> -> vector<1x2xf32>
    %cst_6 = arith.constant 0.000000e+00 : f32
    %6 = vector.broadcast %cst_6 : f32 to vector<1x2xf32>
    %7 = arith.maximumf %5, %6 : vector<1x2xf32>
    %c0_7 = arith.constant 0 : index
    %c0_8 = arith.constant 0 : index
    %8 = vector.load %arg3[%c0_7, %c0_8] : memref<2x8xf32, #tpu.memory_space<vmem>>, vector<2x8xf32>
    %cst_9 = arith.constant dense<0.000000e+00> : vector<1x8xf32>
    %9 = tpu.matmul %7, %8, %cst_9 {dimension_numbers = #tpu.dot_dimension_numbers<[1], [0], [0], [1], [0, 0, 1, 1], [], []>} : vector<1x2xf32>, vector<2x8xf32>, vector<1x8xf32> -> vector<1x8xf32>
    %10 = arith.negf %9 : vector<1x8xf32>
    %11 = math.exp %10 : vector<1x8xf32>
    %cst_10 = arith.constant 1.000000e+00 : f32
    %12 = vector.broadcast %cst_10 : f32 to vector<1x8xf32>
    %13 = arith.addf %12, %11 : vector<1x8xf32>
    %14 = arith.divf %12, %13 : vector<1x8xf32>
    %c0_11 = arith.constant 0 : index
    %c0_12 = arith.constant 0 : index
    %c0_13 = arith.constant 0 : index
    %15 = vector.load %arg1[%c0_11, %c0_12, %c0_13] : memref<1x256x8xf32, #tpu.memory_space<vmem>>, vector<1x256x8xf32>
    %16 = vector.shape_cast %14 : vector<1x8xf32> to vector<1x1x8xf32>
    %17 = vector.broadcast %16 : vector<1x1x8xf32> to vector<1x256x8xf32>
    %18 = arith.mulf %15, %17 : vector<1x256x8xf32>
    %c0_14 = arith.constant 0 : index
    %c0_15 = arith.constant 0 : index
    %c0_16 = arith.constant 0 : index
    %19 = vector.load %arg4[%c0_14, %c0_15, %c0_16] : memref<1x256x8xf32, #tpu.memory_space<vmem>>, vector<1x256x8xf32>
    tpu.vector_store %arg4[%c0_14, %c0_15, %c0_16], %18 {strides = array<i32>} : memref<1x256x8xf32, #tpu.memory_space<vmem>>, vector<1x256x8xf32>,
    return
  }
  func.func @transform_0(%arg0: i32) -> (i32, i32, i32) {
    %c0_i32 = arith.constant 0 : i32
    %c0_i32_0 = arith.constant 0 : i32
    %c0_i32_1 = arith.constant 0 : i32
    return %arg0, %c0_i32, %c0_i32_0 : i32, i32, i32
  }
  func.func @transform_1(%arg0: i32) -> (i32, i32) {
    %c0_i32 = arith.constant 0 : i32
    %c0_i32_0 = arith.constant 0 : i32
    %c0_i32_1 = arith.constant 0 : i32
    return %c0_i32, %c0_i32_0 : i32, i32
  }
  func.func @transform_2(%arg0: i32) -> (i32, i32) {
    %c0_i32 = arith.constant 0 : i32
    %c0_i32_0 = arith.constant 0 : i32
    %c0_i32_1 = arith.constant 0 : i32
    return %c0_i32, %c0_i32_0 : i32, i32
  }
  func.func @transform_3(%arg0: i32) -> (i32, i32, i32) {
    %c0_i32 = arith.constant 0 : i32
    %c0_i32_0 = arith.constant 0 : i32
    %c0_i32_1 = arith.constant 0 : i32
    return %arg0, %c0_i32, %c0_i32_0 : i32, i32, i32
  }
}

</mosaic_0001>

<bundles_post_ra>
// kernel: tpu_custom_call.1
= control target key start
LH: loop header
LB: loop body
LE: loop exit
PB: predicated region body
PF: predicated region fallthrough
CT: control target
= control target key end

     0   :  { %s632_s12 = smov 0   ;;  %s923_s0 = inlined_call_operand.vmem [shape: f32[2,256,8], index: 0, kind: input, shape index: {}]   ;;  %s924_s1 = inlined_call_operand.vmem [shape: f32[8,2], index: 1, kind: input, shape index: {}]   ;;  %s925_s2 = inlined_call_operand.vmem [shape: f32[2,8], index: 2, kind: input, shape index: {}]   ;;  %s926_s3 = inlined_call_operand.vmem [shape: f32[2,256,8], index: 3, kind: output, shape index: {}]  }
   0x1 LB: > { %s557_s13 = sadd.s32 4294967295, %s608_s12   ;;  %p561_p0 = scmp.ge.s32.totalorder %s608_s12, 1  ;;  %s608_s12 = sphi %s632_s12, %s13_s12  }
   0x2   : > { %p137_p1 = scmp.lt.s32.totalorder %s608_s12, 3 }
   0x4   : > { %p138_p2 = pnand %p561_p0, %p137_p1 }
   0x5   : > { %p161_p3 = scmp.lt.s32.totalorder (!%p138_p2), %s557_s13, 1 }
   0x6   : > { %141 = sbr.rel (%p138_p2) target bundleno = 533 (0x215), region = 32 }
   0xb   : > { %v274_v0 = vld [vmem:[%s924_s1] sm:$0xff]  ;;  %v610_v1 = vmov 0.0   ;;  %vm611_vm0 = vmmov 0   ;;  %s928_s13 = smov (!%p161_p3, %s557_s13), 1  ;;  %vm203_vm1 = vcmask 64512   ;;  %vm354_vm2 = vcmask 1041408  }
   0xc   : > { %578 = vmatprep.subr.mxu0 %v610_v1  ;;  %580 = vmatprep.mubr.msk.f32.mxu0 %vm611_vm0, %v610_v1  ;;  %s572_s16 = sshll.u32 %s928_s13, 8  ;;  %vm350_vm3 = vcmask 15360  }
   0xd   : > { %579 = vmatpush3.msra.mxu0 %v274_v0  ;;  %583 = vmatprep.subr.mxu1 %v610_v1  ;;  %s651_s19 = scalar_lea.vmem %s923_s0, %s572_s16  ;;  %s822_s24 = scalar_lea.vmem %s926_s3, %s572_s16 }
   0xe   : > { %585 = vmatprep.mubr.msk.f32.mxu1 %vm611_vm0, %v610_v1  ;;  %v654_v2 = vld [vmem:[%s651_s19] sm:$0xff]  ;;  %v657_v3 = vld [vmem:[%s651_s19 + $0x8] sm:$0xff]  ;;  %v660_v4 = vld [vmem:[%s651_s19 + $0x10] sm:$0xff] }
   0xf   : > { %v663_v5 = vld [vmem:[%s651_s19 + $0x18] sm:$0xff]  ;;  %v204_v6 = vsel %vm203_vm1, %v654_v2, 0.0  ;;  %v205_v7 = vsel %vm203_vm1, %v657_v3, 0.0  ;;  %v207_v8 = vsel %vm203_vm1, %v660_v4, 0.0  ;;  %v672_v9 = vld [vmem:[%s651_s19 + $0x20] sm:$0xff]  ;;  %v677_v12 = vld [vmem:[%s651_s19 + $0x28] sm:$0xff] }
  0x10   : > { %v206_v10 = vadd.f32 %v205_v7, %v204_v6  ;;  %v209_v11 = vsel %vm203_vm1, %v663_v5, 0.0  ;;  %v211_v14 = vsel %vm203_vm1, %v672_v9, 0.0  ;;  %v682_v15 = vld [vmem:[%s651_s19 + $0x30] sm:$0xff]  ;;  %v213_v17 = vsel %vm203_vm1, %v677_v12, 0.0  ;;  %v687_v18 = vld [vmem:[%s651_s19 + $0x38] sm:$0xff]  ;;  %v692_v21 = vld [vmem:[%s651_s19 + $0x40] sm:$0xff] }
  0x11   : > { %v215_v20 = vsel %vm203_vm1, %v682_v15, 0.0  ;;  %v217_v23 = vsel %vm203_vm1, %v687_v18, 0.0  ;;  %v697_v24 = vld [vmem:[%s651_s19 + $0x48] sm:$0xff]  ;;  %v219_v26 = vsel %vm203_vm1, %v692_v21, 0.0  ;;  %v702_v27 = vld [vmem:[%s651_s19 + $0x50] sm:$0xff]  ;;  %v707_v30 = vld [vmem:[%s651_s19 + $0x58] sm:$0xff] }
  0x12   : > { %v208_v13 = vadd.f32 %v207_v8, %v206_v10  ;;  %v221_v29 = vsel %vm203_vm1, %v697_v24, 0.0  ;;  %v223_v32 = vsel %vm203_vm1, %v702_v27, 0.0  ;;  %v712_v33 = vld [vmem:[%s651_s19 + $0x60] sm:$0xff]  ;;  %v225_v35 = vsel %vm203_vm1, %v707_v30, 0.0  ;;  %v717_v36 = vld [vmem:[%s651_s19 + $0x68] sm:$0xff]  ;;  %v722_v39 = vld [vmem:[%s651_s19 + $0x70] sm:$0xff] }
  0x13   : > { %v227_v38 = vsel %vm203_vm1, %v712_v33, 0.0  ;;  %v229_v41 = vsel %vm203_vm1, %v717_v36, 0.0  ;;  %v727_v42 = vld [vmem:[%s651_s19 + $0x78] sm:$0xff]  ;;  %v231_v44 = vsel %vm203_vm1, %v722_v39, 0.0  ;;  %v732_v45 = vld [vmem:[%s651_s19 + $0x80] sm:$0xff]  ;;  %v737_v48 = vld [vmem:[%s651_s19 + $0x88] sm:$0xff] }
  0x14   : > { %v210_v16 = vadd.f32 %v209_v11, %v208_v13  ;;  %v233_v47 = vsel %vm203_vm1, %v727_v42, 0.0  ;;  %v235_v50 = vsel %vm203_vm1, %v732_v45, 0.0  ;;  %v742_v51 = vld [vmem:[%s651_s19 + $0x90] sm:$0xff]  ;;  %v237_v53 = vsel %vm203_vm1, %v737_v48, 0.0  ;;  %v747_v54 = vld [vmem:[%s651_s19 + $0x98] sm:$0xff]  ;;  %v752_v57 = vld [vmem:[%s651_s19 + $0xa0] sm:$0xff] }
  0x15   : > { %v239_v56 = vsel %vm203_vm1, %v742_v51, 0.0  ;;  %v241_v59 = vsel %vm203_vm1, %v747_v54, 0.0  ;;  %v757_v60 = vld [vmem:[%s651_s19 + $0xa8] sm:$0xff]  ;;  %v243_v62 = vsel %vm203_vm1, %v752_v57, 0.0  ;;  %v762_v63 = vld [vmem:[%s651_s19 + $0xb0] sm:$0xff]  ;;  %v767_v6 = vld [vmem:[%s651_s19 + $0xb8] sm:$0xff] }
  0x16   : > { %v212_v19 = vadd.f32 %v211_v14, %v210_v16  ;;  %v245_v1 = vsel %vm203_vm1, %v757_v60, 0.0  ;;  %v247_v8 = vsel %vm203_vm1, %v762_v63, 0.0  ;;  %v772_v10 = vld [vmem:[%s651_s19 + $0xc0] sm:$0xff]  ;;  %v249_v13 = vsel %vm203_vm1, %v767_v6, 0.0  ;;  %v777_v14 = vld [vmem:[%s651_s19 + $0xc8] sm:$0xff] }
  0x18   : > { %v214_v22 = vadd.f32 %v213_v17, %v212_v19  ;;  %v251_v17 = vsel %vm203_vm1, %v772_v10, 0.0  ;;  %v782_v19 = vld [vmem:[%s651_s19 + $0xd0] sm:$0xff] }
  0x1a   : > { %v216_v25 = vadd.f32 %v215_v20, %v214_v22  ;;  %v253_v22 = vsel %vm203_vm1, %v777_v14, 0.0 }
  0x1c   : > { %v218_v28 = vadd.f32 %v217_v23, %v216_v25  ;;  %v787_v23 = vld [vmem:[%s651_s19 + $0xd8] sm:$0xff] }
  0x1e   : > { %v220_v31 = vadd.f32 %v219_v26, %v218_v28  ;;  %v255_v26 = vsel %vm203_vm1, %v782_v19, 0.0  ;;  %v792_v28 = vld [vmem:[%s651_s19 + $0xe0] sm:$0xff] }
  0x20   : > { %v222_v34 = vadd.f32 %v221_v29, %v220_v31  ;;  %v257_v31 = vsel %vm203_vm1, %v787_v23, 0.0 }
  0x22   : > { %v224_v37 = vadd.f32 %v223_v32, %v222_v34  ;;  %v797_v32 = vld [vmem:[%s651_s19 + $0xe8] sm:$0xff] }
  0x24   : > { %v226_v40 = vadd.f32 %v225_v35, %v224_v37  ;;  %v259_v35 = vsel %vm203_vm1, %v792_v28, 0.0  ;;  %v802_v37 = vld [vmem:[%s651_s19 + $0xf0] sm:$0xff] }
  0x26   : > { %v228_v43 = vadd.f32 %v227_v38, %v226_v40  ;;  %v261_v40 = vsel %vm203_vm1, %v797_v32, 0.0 }
  0x28   : > { %v230_v46 = vadd.f32 %v229_v41, %v228_v43  ;;  %v807_v41 = vld [vmem:[%s651_s19 + $0xf8] sm:$0xff] }
  0x2a   : > { %v232_v49 = vadd.f32 %v231_v44, %v230_v46  ;;  %v263_v44 = vsel %vm203_vm1, %v802_v37, 0.0 }
  0x2c   : > { %v234_v52 = vadd.f32 %v233_v47, %v232_v49  ;;  %v265_v47 = vsel %vm203_vm1, %v807_v41, 0.0 }
  0x2e   : > { %v236_v55 = vadd.f32 %v235_v50, %v234_v52 }
  0x30   : > { %v238_v58 = vadd.f32 %v237_v53, %v236_v55 }
  0x32   : > { %v240_v61 = vadd.f32 %v239_v56, %v238_v58 }
  0x34   : > { %v242_v0 = vadd.f32 %v241_v59, %v240_v61 }
  0x36   : > { %v244_v7 = vadd.f32 %v243_v62, %v242_v0  ;;  %v349_v62 = vld [vmem:[%s925_s2] sm:$0x3] }
  0x37   : > { %584 = vmatpush3.msk.msra.mxu1 %vm354_vm2, %v349_v62 }
  0x38   : > { %v246_v11 = vadd.f32 %v245_v1, %v244_v7 }
  0x3a   : > { %v248_v16 = vadd.f32 %v247_v8, %v246_v11 }
  0x3c   : > { %v250_v20 = vadd.f32 %v249_v13, %v248_v16 }
  0x3e   : > { %v252_v25 = vadd.f32 %v251_v17, %v250_v20  ;;  %v434_v20 = vlaneseq }
  0x40   : > { %v254_v29 = vadd.f32 %v253_v22, %v252_v25  ;;  %v435_v22 = vshrl.u32 %v434_v20, 7 }
  0x42   : > { %v256_v34 = vadd.f32 %v255_v26, %v254_v29  ;;  %v436_v25 = vsub.s32 0, %v435_v22 }
  0x44   : > { %v258_v38 = vadd.f32 %v257_v31, %v256_v34 }
  0x46   : > { %v260_v43 = vadd.f32 %v259_v35, %v258_v38 }
  0x48   : > { %v262_v46 = vadd.f32 %v261_v40, %v260_v43 }
  0x4a   : > { %v264_v49 = vadd.f32 %v263_v44, %v262_v46 }
  0x4c   : > { %v266_v50 = vadd.f32 %v265_v47, %v264_v49 }
  0x4e   : > { %v267_v52 = vrot.slane %v266_v50, 4 }
  0x50   : > { %v268_v53 = vadd.f32 %v267_v52, %v266_v50 }
  0x52   : > { %v269_v55 = vrot.slane %v268_v53, 2 }
  0x54   : > { %v270_v56 = vadd.f32 %v269_v55, %v268_v53 }
  0x56   : > { %v271_v58 = vrot.slane %v270_v56, 1 }
  0x58   : > { %v272_v59 = vadd.f32 %v271_v58, %v270_v56 }
  0x5a   : > { %v273_v61 = vmul.f32 0.00390625, %v272_v59 }
  0x5c   : > { %581 = vmatmul.mubr.msk.f32.vlgmr.msra.gmra.mxu0 %vm203_vm1, %v273_v61 }
 0x11c   : > { %v344_v0 = vpop.f32.mrf.mxu0 }
 0x11d   : > { %v348_v1 = vmax.f32 %v344_v0, 0.0 }
 0x11e   : > { %v582_v7 = vpop.f32.mrf.mxu0 }
 0x11f   : > { %586 = vmatmul.mubr.msk.f32.vlgmr.msra.gmra.mxu1 %vm350_vm3, %v348_v1 }
 0x1df   : > { %v424_v8 = vpop.f32.mrf.mxu1 }
 0x1e0   : > { %v569_v11 = vmul.f32 -1.442695, %v424_v8 }
 0x1e1   : > { %v587_v13 = vpop.f32.mrf.mxu1 }
 0x1e2   : > { %598 = vpow2.f32 %v569_v11 }
 0x1ef   : > { %v599_v16 = vpop.eup %598 }
 0x1f0   : > { %v431_v17 = vadd.f32 1.0, %v599_v16 }
 0x1f2   : > { %600 = vrcp.f32 %v431_v17 }
 0x1ff   : > { %v601_v26 = vpop.eup %600 }
 0x200   : > { %v437_v29 = vrot.slane %v601_v26, %v436_v25 }
 0x202   : > { %v438_v31 = vmul.f32 %v437_v29, %v654_v2  ;;  %v439_v34 = vmul.f32 %v437_v29, %v657_v3  ;;  %v440_v35 = vmul.f32 %v437_v29, %v660_v4  ;;  %v441_v38 = vmul.f32 %v437_v29, %v663_v5 }
 0x203   : > { %v442_v40 = vmul.f32 %v437_v29, %v672_v9  ;;  %v443_v43 = vmul.f32 %v437_v29, %v677_v12  ;;  %v444_v44 = vmul.f32 %v437_v29, %v682_v15  ;;  %v445_v46 = vmul.f32 %v437_v29, %v687_v18 }
 0x204   : > { %v446_v2 = vmul.f32 %v437_v29, %v692_v21  ;;  %v447_v3 = vmul.f32 %v437_v29, %v697_v24  ;;  %v448_v4 = vmul.f32 %v437_v29, %v702_v27  ;;  %v449_v5 = vmul.f32 %v437_v29, %v707_v30  ;;  %470 = vst.msk [vmem:[%s822_s24] sm:$0xff] %vm203_vm1, %v438_v31 }
 0x205   : > { %471 = vst.msk [vmem:[%s822_s24 + $0x8] sm:$0xff] %vm203_vm1, %v439_v34  ;;  %472 = vst.msk [vmem:[%s822_s24 + $0x10] sm:$0xff] %vm203_vm1, %v440_v35  ;;  %v450_v9 = vmul.f32 %v437_v29, %v712_v33  ;;  %v451_v12 = vmul.f32 %v437_v29, %v717_v36  ;;  %v452_v15 = vmul.f32 %v437_v29, %v722_v39 }
 0x206   : > { %473 = vst.msk [vmem:[%s822_s24 + $0x18] sm:$0xff] %vm203_vm1, %v441_v38  ;;  %v453_v18 = vmul.f32 %v437_v29, %v727_v42  ;;  %474 = vst.msk [vmem:[%s822_s24 + $0x20] sm:$0xff] %vm203_vm1, %v442_v40  ;;  %v454_v21 = vmul.f32 %v437_v29, %v732_v45  ;;  %v455_v24 = vmul.f32 %v437_v29, %v737_v48 }
 0x207   : > { %475 = vst.msk [vmem:[%s822_s24 + $0x28] sm:$0xff] %vm203_vm1, %v443_v43  ;;  %476 = vst.msk [vmem:[%s822_s24 + $0x30] sm:$0xff] %vm203_vm1, %v444_v44  ;;  %v456_v27 = vmul.f32 %v437_v29, %v742_v51  ;;  %v457_v30 = vmul.f32 %v437_v29, %v747_v54  ;;  %v458_v33 = vmul.f32 %v437_v29, %v752_v57 }
 0x208   : > { %477 = vst.msk [vmem:[%s822_s24 + $0x38] sm:$0xff] %vm203_vm1, %v445_v46  ;;  %478 = vst.msk [vmem:[%s822_s24 + $0x40] sm:$0xff] %vm203_vm1, %v446_v2  ;;  %v459_v36 = vmul.f32 %v437_v29, %v757_v60  ;;  %v460_v39 = vmul.f32 %v437_v29, %v762_v63  ;;  %v461_v42 = vmul.f32 %v437_v29, %v767_v6 }
 0x209   : > { %479 = vst.msk [vmem:[%s822_s24 + $0x48] sm:$0xff] %vm203_vm1, %v447_v3  ;;  %480 = vst.msk [vmem:[%s822_s24 + $0x50] sm:$0xff] %vm203_vm1, %v448_v4  ;;  %v462_v45 = vmul.f32 %v437_v29, %v772_v10  ;;  %v463_v48 = vmul.f32 %v437_v29, %v777_v14  ;;  %v464_v51 = vmul.f32 %v437_v29, %v782_v19 }
 0x20a   : > { %481 = vst.msk [vmem:[%s822_s24 + $0x58] sm:$0xff] %vm203_vm1, %v449_v5  ;;  %482 = vst.msk [vmem:[%s822_s24 + $0x60] sm:$0xff] %vm203_vm1, %v450_v9  ;;  %v465_v54 = vmul.f32 %v437_v29, %v787_v23  ;;  %v466_v57 = vmul.f32 %v437_v29, %v792_v28  ;;  %v467_v60 = vmul.f32 %v437_v29, %v797_v32 }
 0x20b   : > { %483 = vst.msk [vmem:[%s822_s24 + $0x68] sm:$0xff] %vm203_vm1, %v451_v12  ;;  %484 = vst.msk [vmem:[%s822_s24 + $0x70] sm:$0xff] %vm203_vm1, %v452_v15  ;;  %v468_v63 = vmul.f32 %v437_v29, %v802_v37  ;;  %v469_v6 = vmul.f32 %v437_v29, %v807_v41 }
 0x20c   : > { %485 = vst.msk [vmem:[%s822_s24 + $0x78] sm:$0xff] %vm203_vm1, %v453_v18  ;;  %486 = vst.msk [vmem:[%s822_s24 + $0x80] sm:$0xff] %vm203_vm1, %v454_v21 }
 0x20d   : > { %487 = vst.msk [vmem:[%s822_s24 + $0x88] sm:$0xff] %vm203_vm1, %v455_v24  ;;  %488 = vst.msk [vmem:[%s822_s24 + $0x90] sm:$0xff] %vm203_vm1, %v456_v27 }
 0x20e   : > { %489 = vst.msk [vmem:[%s822_s24 + $0x98] sm:$0xff] %vm203_vm1, %v457_v30  ;;  %490 = vst.msk [vmem:[%s822_s24 + $0xa0] sm:$0xff] %vm203_vm1, %v458_v33 }
 0x20f   : > { %491 = vst.msk [vmem:[%s822_s24 + $0xa8] sm:$0xff] %vm203_vm1, %v459_v36  ;;  %492 = vst.msk [vmem:[%s822_s24 + $0xb0] sm:$0xff] %vm203_vm1, %v460_v39 }
 0x210   : > { %493 = vst.msk [vmem:[%s822_s24 + $0xb8] sm:$0xff] %vm203_vm1, %v461_v42  ;;  %494 = vst.msk [vmem:[%s822_s24 + $0xc0] sm:$0xff] %vm203_vm1, %v462_v45 }
 0x211   : > { %495 = vst.msk [vmem:[%s822_s24 + $0xc8] sm:$0xff] %vm203_vm1, %v463_v48  ;;  %496 = vst.msk [vmem:[%s822_s24 + $0xd0] sm:$0xff] %vm203_vm1, %v464_v51 }
 0x212   : > { %497 = vst.msk [vmem:[%s822_s24 + $0xd8] sm:$0xff] %vm203_vm1, %v465_v54  ;;  %498 = vst.msk [vmem:[%s822_s24 + $0xe0] sm:$0xff] %vm203_vm1, %v466_v57 }
 0x213   : > { %499 = vst.msk [vmem:[%s822_s24 + $0xe8] sm:$0xff] %vm203_vm1, %v467_v60  ;;  %500 = vst.msk [vmem:[%s822_s24 + $0xf0] sm:$0xff] %vm203_vm1, %v468_v63 }
 0x214   : > { %501 = vst.msk [vmem:[%s822_s24 + $0xf8] sm:$0xff] %vm203_vm1, %v469_v6 }
 0x215 PF: > { %s13_s12 = sadd.s32 1, %s608_s12  }
 0x216   : > { %p10_p4 = scmp.ge.s32.totalorder %s13_s12, 4  }
 0x218   :  { %12 = sbr.rel (!%p10_p4) target bundleno = 1 (0x1), region = 62 }

</bundles_post_ra>
